<compile_context>
chip_gen: v5e
topology: v5e:2x2
jax: 0.10.0
libtpu: 0.0.40
codegen_flags: <defaults>
</compile_context>

<pallas_src>
import functools
import math

import jax
import jax.numpy as jnp
from jax.experimental import pallas as pl
from jax.experimental.pallas import tpu as pltpu


def _range_constraint_kernel(x_ref, lo_ref, hi_ref, o_ref):
    """Full-width clamp: lo/hi are (1, TW) and broadcast over the (TR, TW) tile."""
    o_ref[...] = jnp.minimum(jnp.maximum(x_ref[...], lo_ref[...]), hi_ref[...])


def _pass_through_sentinels(num_products: int, dtype):
    """Sentinel bounds for the priority half so clamping passes values through."""
    if jnp.issubdtype(dtype, jnp.floating):
        lo = jnp.full((num_products,), -jnp.inf, dtype=dtype)
        hi = jnp.full((num_products,), jnp.inf, dtype=dtype)
    else:
        info = jnp.iinfo(dtype)
        lo = jnp.full((num_products,), info.min, dtype=dtype)
        hi = jnp.full((num_products,), info.max, dtype=dtype)
    return lo, hi


def _vmem_budget():
    """Chip-adaptive (target_tile_bytes, vmem_limit_bytes)."""
    try:
        phys = pltpu.get_tpu_info().vmem_capacity_bytes
    except Exception:
        phys = 64 * 1024 * 1024              # unknown -> assume smallest (v7x per-TC)
    if phys >= 128 * 1024 * 1024:            # v5e / v6e: 128 MiB physical VMEM
        return 8 * 1024 * 1024, 64 * 1024 * 1024
    return 4 * 1024 * 1024, 32 * 1024 * 1024  # v7x: 64 MiB per TensorCore


def _range_constraint_impl(x: jax.Array,
                           product_ranges: jax.Array,
                           number_of_products: int) -> jax.Array:
    # Mirror the PyTorch early-return: fewer than 2 elements => identity.
    if product_ranges.size < 2:
        return x

    B, S, F = x.shape
    P = number_of_products
    assert F == 2 * P, f"last dim {F} must equal 2*number_of_products={2 * P}"

    dtype = x.dtype
    itemsize = jnp.dtype(dtype).itemsize

    # ---- Full-width (F,) bounds: real bounds for schedules, sentinels for
    # ---- priorities (clamp is a pass-through there).
    mins_p = product_ranges[:, 0].astype(dtype)
    maxs_p = product_ranges[:, 1].astype(dtype)
    lo_pass, hi_pass = _pass_through_sentinels(P, dtype)
    mins_full = jnp.concatenate([mins_p, lo_pass])   # (F,)
    maxs_full = jnp.concatenate([maxs_p, hi_pass])   # (F,)

    R = B * S
    x_flat = x.reshape(R, F)

    # ---- Lane-dense repack: fold r rows so the packed row width W = r*F is a
    # ---- multiple of 128 lanes.  Bounds repeat with period F, so tiling them
    # ---- r times keeps the clamp elementwise-identical.
    r = 128 // math.gcd(F, 128)
    R_bulk = (R // r) * r
    if R_bulk == 0:
        # Whole tensor smaller than one repack group -> trivially small; plain clip.
        out = jnp.clip(x_flat, mins_full[None, :], maxs_full[None, :])
        return out.reshape(B, S, F)

    R2 = R_bulk // r
    W = r * F
    lo_row = jnp.tile(mins_full, (r,)).reshape(1, W)
    hi_row = jnp.tile(maxs_full, (r,)).reshape(1, W)

    tile_bytes, vmem_limit = _vmem_budget()

    # ---- Row tiling: dtype-native sublane multiple, prefer a TR dividing R2.
    sub = {4: 8, 2: 16, 1: 32}.get(itemsize, 8)
    bytes_per_row = W * itemsize
    if R2 <= sub:
        TR = R2
    else:
        TR = min(R2, max(sub, tile_bytes // bytes_per_row))
        TR = max(sub, (TR // sub) * sub)
        if TR > R2:
            TR = R2
        if TR < R2 and R2 % TR != 0:
            # Bounded search for a divisor of R2 (avoids a masked final step).
            for cand in range(TR, max(sub - 1, TR - 64 * sub), -sub):
                if R2 % cand == 0:
                    TR = cand
                    break

    # ---- Column split: only when the row grid is too short to pipeline /
    # ---- feed both v7x TensorCores and W has >=2 lane-dense 128-wide blocks.
    n_row_tiles = pl.cdiv(R2, TR)
    if n_row_tiles < 2 and W >= 256:
        tw_cap = max(128, (tile_bytes // max(1, TR * itemsize)) // 128 * 128)
        TW = max(128, min((W // 2) // 128 * 128, tw_cap))
        for cand in range(TW, max(127, TW - 64 * 128), -128):  # prefer divisor of W
            if W % cand == 0:
                TW = cand
                break
    else:
        TW = W

    grid = (pl.cdiv(R2, TR), pl.cdiv(W, TW))

    x2 = x_flat[:R_bulk].reshape(R2, W)

    out2 = pl.pallas_call(
        _range_constraint_kernel,
        out_shape=jax.ShapeDtypeStruct((R2, W), dtype),
        grid=grid,
        in_specs=[
            pl.BlockSpec((TR, TW), lambda i, j: (i, j)),   # x tile (auto-pipelined)
            pl.BlockSpec((1, TW), lambda i, j: (0, j)),    # lo bounds (resident per col)
            pl.BlockSpec((1, TW), lambda i, j: (0, j)),    # hi bounds
        ],
        out_specs=pl.BlockSpec((TR, TW), lambda i, j: (i, j)),
        compiler_params=pltpu.CompilerParams(
            dimension_semantics=("parallel", "parallel"),
            vmem_limit_bytes=vmem_limit,
        ),
    )(x2, lo_row, hi_row)

    out_flat = out2.reshape(R_bulk, F)
    if R_bulk < R:
        # <r leftover rows: tiny plain-JAX clip tail so the bulk stays lane-dense.
        tail = jnp.clip(x_flat[R_bulk:], mins_full[None, :], maxs_full[None, :])
        out_flat = jnp.concatenate([out_flat, tail], axis=0)
    return out_flat.reshape(B, S, F)


# jit so the wrapper-side bound construction / reshapes constant-fold & fuse.
range_constraint = jax.jit(_range_constraint_impl, static_argnums=(2,))


if __name__ == "__main__":
    # Deterministic synthetic setup (no checkpoint loading).
    batch, seq, num_products = 2, 8, 4

    # product_ranges: (num_products, 2) -> [min, max] per product.
    product_ranges = jnp.array(
        [[0.0, 1.0],
         [-10.0, 20.0],
         [9.0, 10.0],
         [-1.0, 1.0]], dtype=jnp.float32)

    key = jax.random.PRNGKey(0)
    x = jax.random.normal(key, (batch, seq, 2 * num_products),
                          dtype=jnp.float32) * 15.0

    out = range_constraint(x, product_ranges, num_products)
    out = jax.block_until_ready(out)

    # Reference check in plain JAX (same semantics as the PyTorch module).
    sched, prio = x[..., :num_products], x[..., num_products:]
    mn = product_ranges[:, 0].reshape(1, 1, -1)
    mx = product_ranges[:, 1].reshape(1, 1, -1)
    ref = jnp.concatenate([jnp.clip(sched, mn, mx), prio], axis=-1)
    assert out.shape == (batch, seq, 2 * num_products)
    assert jnp.allclose(out, ref), "mismatch vs reference"

    print("KERNEL_OK")
</pallas_src>

<mosaic_0001>
module attributes {stable_mosaic.version = 11 : i64} {
  func.func @_range_constraint_kernel(%arg0: i32, %arg1: i32, %arg2: memref<1x128xf32, #tpu.memory_space<vmem>>, %arg3: memref<1x128xf32, #tpu.memory_space<vmem>>, %arg4: memref<1x128xf32, #tpu.memory_space<vmem>>, %arg5: memref<1x128xf32, #tpu.memory_space<vmem>>) attributes {dimension_semantics = [#tpu.dimension_semantics<parallel>, #tpu.dimension_semantics<parallel>], iteration_bounds = array<i64: 1, 1>, scalar_prefetch = 0 : i64, scratch_operands = 0 : i64, tpu.core_type = #tpu.core_type<tc>, window_params = [{transform_indices = @transform_0, window_bounds = array<i64: 1, 128>}, {transform_indices = @transform_1, window_bounds = array<i64: 1, 128>}, {transform_indices = @transform_2, window_bounds = array<i64: 1, 128>}, {transform_indices = @transform_3, window_bounds = array<i64: 1, 128>}]} {
    %c0 = arith.constant 0 : index
    %c0_0 = arith.constant 0 : index
    %0 = vector.load %arg2[%c0, %c0_0] : memref<1x128xf32, #tpu.memory_space<vmem>>, vector<1x128xf32>
    %c0_1 = arith.constant 0 : index
    %c0_2 = arith.constant 0 : index
    %1 = vector.load %arg3[%c0_1, %c0_2] : memref<1x128xf32, #tpu.memory_space<vmem>>, vector<1x128xf32>
    %2 = arith.maximumf %0, %1 : vector<1x128xf32>
    %c0_3 = arith.constant 0 : index
    %c0_4 = arith.constant 0 : index
    %3 = vector.load %arg4[%c0_3, %c0_4] : memref<1x128xf32, #tpu.memory_space<vmem>>, vector<1x128xf32>
    %4 = arith.minimumf %2, %3 : vector<1x128xf32>
    %c0_5 = arith.constant 0 : index
    %c0_6 = arith.constant 0 : index
    %5 = vector.load %arg5[%c0_5, %c0_6] : memref<1x128xf32, #tpu.memory_space<vmem>>, vector<1x128xf32>
    tpu.vector_store %arg5[%c0_5, %c0_6], %4 {strides = array<i32>} : memref<1x128xf32, #tpu.memory_space<vmem>>, vector<1x128xf32>,
    return
  }
  func.func @transform_0(%arg0: i32, %arg1: i32) -> (i32, i32) {
    %c0_i32 = arith.constant 0 : i32
    return %arg0, %arg1 : i32, i32
  }
  func.func @transform_1(%arg0: i32, %arg1: i32) -> (i32, i32) {
    %c0_i32 = arith.constant 0 : i32
    %c0_i32_0 = arith.constant 0 : i32
    return %c0_i32, %arg1 : i32, i32
  }
  func.func @transform_2(%arg0: i32, %arg1: i32) -> (i32, i32) {
    %c0_i32 = arith.constant 0 : i32
    %c0_i32_0 = arith.constant 0 : i32
    return %c0_i32, %arg1 : i32, i32
  }
  func.func @transform_3(%arg0: i32, %arg1: i32) -> (i32, i32) {
    %c0_i32 = arith.constant 0 : i32
    return %arg0, %arg1 : i32, i32
  }
}

</mosaic_0001>

<bundles_post_ra>
// kernel: tile.13
= control target key start
LH: loop header
LB: loop body
LE: loop exit
PB: predicated region body
PF: predicated region fallthrough
CT: control target
= control target key end

     0   :  { %s28_s0 = inlined_call_operand.vmem [shape: f32[8], index: 0, kind: input, shape index: {}]   ;;  %s29_s1 = inlined_call_operand.vmem [shape: f32[16,8], index: 1, kind: output, shape index: {}]  }
   0x1   :  { %v4_v0 = vld [vmem:[%s28_s0] ss:$0 sm:$0xff] }
   0x2   :  { %5 = vst [vmem:[%s29_s1] sm:$0xff] %v4_v0 }
   0x3   :  { %8 = vst [vmem:[%s29_s1 + $0x8] sm:$0xff] %v4_v0 }

// kernel: tile.14
= control target key start
LH: loop header
LB: loop body
LE: loop exit
PB: predicated region body
PF: predicated region fallthrough
CT: control target
= control target key end

     0   :  { %s131_s10 = smov 120   ;;  %s132_s11 = smov 104   ;;  %vm3_vm0 = vcmask 64512   ;;  %vm9_vm1 = vcmask 1048512   ;;  %vm15_vm2 = vcmask 982912   ;;  %vm21_vm3 = vcmask 917312   ;;  %s207_s0 = inlined_call_operand.vmem [shape: f32[16,8], index: 0, kind: input, shape index: {}]   ;;  %s208_s1 = inlined_call_operand.vmem [shape: f32[1,128], index: 1, kind: output, shape index: {}]  }
   0x1   :  { %v101_v0 = vld [vmem:[%s207_s0 + $0xf] sm:$0x1]   ;;  %v103_v1 = vld [vmem:[%s207_s0 + $0xd] sm:$0x1]   ;;  %v105_v2 = vld [vmem:[%s207_s0 + $0xb] sm:$0x1]  }
   0x2   :  { %7 = vrot.lane.b32.xlu0 %v101_v0, %s131_s10  ;;  %19 = vrot.lane.b32.xlu1 %v103_v1, %s132_s11  ;;  %s133_s14 = smov 88   ;;  %v102_v3 = vld [vmem:[%s207_s0 + $0xe] sm:$0x1]   ;;  %v104_v4 = vld [vmem:[%s207_s0 + $0xc] sm:$0x1]   ;;  %s134_s19 = smov 112  }
   0x3   :  { %31 = vrot.lane.b32.xlu2 %v105_v2, %s133_s14  ;;  %s135_s20 = smov 96   ;;  %v106_v5 = vld [vmem:[%s207_s0 + $0xa] sm:$0x1]   ;;  %s136_s23 = smov 80   ;;  %v107_v6 = vld [vmem:[%s207_s0 + $0x9] sm:$0x1]  }
   0x4   :  { %v108_v7 = vld [vmem:[%s207_s0 + $0x8] sm:$0x1]   ;;  %s137_s28 = smov 72   ;;  %s138_s29 = smov 64   ;;  %v109_v8 = vld [vmem:[%s207_s0 + $0x7] sm:$0x1]  }
   0x5   :  { %s139_s3 = smov 56   ;;  %v110_v9 = vld [vmem:[%s207_s0 + $0x6] sm:$0x1]   ;;  %v111_v10 = vld [vmem:[%s207_s0 + $0x5] sm:$0x1]   ;;  %s140_s8 = smov 48  }
   0x6   :  { %s141_s9 = smov 40   ;;  %v112_v11 = vld [vmem:[%s207_s0 + $0x4] sm:$0x1]   ;;  %s142_s12 = smov 32   ;;  %v113_v12 = vld [vmem:[%s207_s0 + $0x3] sm:$0x1]  }
   0x7   :  { %v114_v13 = vld [vmem:[%s207_s0 + $0x2] sm:$0x1]   ;;  %s143_s17 = smov 24   ;;  %s144_s18 = smov 16   ;;  %v115_v14 = vld [vmem:[%s207_s0 + $0x1] sm:$0x1]  }
   0x8   :  { %s145_s21 = smov 8   ;;  %v2_v15 = vld [vmem:[%s207_s0] sm:$0x1]   ;;  %vm27_vm4 = vcmask 851712   ;;  %vm33_vm5 = vcmask 786112   ;;  %vm39_vm6 = vcmask 720512  }
   0x9   :  { %4 = vst.msk [vmem:[#allocation0] sm:$0x1] %vm3_vm0, %v2_v15   ;;  %vm45_vm7 = vcmask 654912   ;;  %vm51_vm8 = vcmask 589312   ;;  %vm57_vm9 = vcmask 523712   ;;  %vm63_vm10 = vcmask 458112  }
   0xa   :  { %13 = vrot.lane.b32.xlu0 %v102_v3, %s134_s19  ;;  %25 = vrot.lane.b32.xlu1 %v104_v4, %s135_s20  ;;  %vm69_vm11 = vcmask 392512   ;;  %vm75_vm12 = vcmask 326912   ;;  %vm81_vm13 = vcmask 261312   ;;  %vm87_vm14 = vcmask 195712  }
   0xb   :  { %37 = vrot.lane.b32.xlu2 %v106_v5, %s136_s23  ;;  %vm93_vm15 = vcmask 130112  }
  0x12   :  { %43 = vrot.lane.b32.xlu0 %v107_v6, %s137_s28  ;;  %49 = vrot.lane.b32.xlu1 %v108_v7, %s138_s29 }
  0x13   :  { %55 = vrot.lane.b32.xlu2 %v109_v8, %s139_s3 }
  0x1a   :  { %61 = vrot.lane.b32.xlu0 %v110_v9, %s140_s8  ;;  %67 = vrot.lane.b32.xlu1 %v111_v10, %s141_s9 }
  0x1b   :  { %73 = vrot.lane.b32.xlu2 %v112_v11, %s142_s12 }
  0x22   :  { %79 = vrot.lane.b32.xlu0 %v113_v12, %s143_s17  ;;  %85 = vrot.lane.b32.xlu1 %v114_v13, %s144_s18 }
  0x23   :  { %91 = vrot.lane.b32.xlu2 %v115_v14, %s145_s21 }
  0x5d   :  { %v32_v16 = vpop.permute.xlu2 %31  }
  0x65   :  { %v38_v17 = vpop.permute.xlu2 %37  }
  0x6d   :  { %v56_v18 = vpop.permute.xlu2 %55  }
  0x74   :  { %v8_v19 = vpop.permute.xlu0 %7   ;;  %v20_v20 = vpop.permute.xlu1 %19  }
  0x75   :  { %10 = vst.msk [vmem:[#allocation0] sm:$0x1] %vm9_vm1, %v8_v19   ;;  %v74_v21 = vpop.permute.xlu2 %73  }
  0x7c   :  { %v14_v22 = vpop.permute.xlu0 %13   ;;  %v26_v23 = vpop.permute.xlu1 %25  }
  0x7d   :  { %16 = vst.msk [vmem:[#allocation0] sm:$0x1] %vm15_vm2, %v14_v22   ;;  %v92_v24 = vpop.permute.xlu2 %91  }
  0x7e   :  { %22 = vst.msk [vmem:[#allocation0] sm:$0x1] %vm21_vm3, %v20_v20  }
  0x7f   :  { %28 = vst.msk [vmem:[#allocation0] sm:$0x1] %vm27_vm4, %v26_v23  }
  0x80   :  { %34 = vst.msk [vmem:[#allocation0] sm:$0x1] %vm33_vm5, %v32_v16  }
  0x81   :  { %40 = vst.msk [vmem:[#allocation0] sm:$0x1] %vm39_vm6, %v38_v17  }
  0x84   :  { %v44_v25 = vpop.permute.xlu0 %43   ;;  %v50_v26 = vpop.permute.xlu1 %49  }
  0x85   :  { %46 = vst.msk [vmem:[#allocation0] sm:$0x1] %vm45_vm7, %v44_v25  }
  0x86   :  { %52 = vst.msk [vmem:[#allocation0] sm:$0x1] %vm51_vm8, %v50_v26  }
  0x87   :  { %58 = vst.msk [vmem:[#allocation0] sm:$0x1] %vm57_vm9, %v56_v18  }
  0x8c   :  { %v62_v27 = vpop.permute.xlu0 %61   ;;  %v68_v28 = vpop.permute.xlu1 %67  }
  0x8d   :  { %64 = vst.msk [vmem:[#allocation0] sm:$0x1] %vm63_vm10, %v62_v27  }
  0x8e   :  { %70 = vst.msk [vmem:[#allocation0] sm:$0x1] %vm69_vm11, %v68_v28  }
  0x8f   :  { %76 = vst.msk [vmem:[#allocation0] sm:$0x1] %vm75_vm12, %v74_v21  }
  0x94   :  { %v80_v29 = vpop.permute.xlu0 %79   ;;  %v86_v30 = vpop.permute.xlu1 %85  }
  0x95   :  { %82 = vst.msk [vmem:[#allocation0] sm:$0x1] %vm81_vm13, %v80_v29  }
  0x96   :  { %88 = vst.msk [vmem:[#allocation0] sm:$0x1] %vm87_vm14, %v86_v30  }
  0x97   :  { %94 = vst.msk [vmem:[#allocation0] sm:$0x1] %vm93_vm15, %v92_v24  }
  0x9e   :  { %v97_v31 = vld [vmem:[#allocation0] sm:$0x1] }
  0x9f   :  { %100 = vst [vmem:[%s208_s1] sm:$0x1] %v97_v31 }

// kernel: _range_constraint_impl.1
= control target key start
LH: loop header
LB: loop body
LE: loop exit
PB: predicated region body
PF: predicated region fallthrough
CT: control target
= control target key end

     0   :  { %s56_s0 = inlined_call_operand.vmem [shape: f32[1,128], index: 0, kind: input, shape index: {}]   ;;  %s57_s1 = inlined_call_operand.vmem [shape: f32[1,128], index: 1, kind: input, shape index: {}]   ;;  %s58_s2 = inlined_call_operand.vmem [shape: f32[1,128], index: 2, kind: input, shape index: {}]   ;;  %s59_s3 = inlined_call_operand.vmem [shape: f32[1,128], index: 3, kind: output, shape index: {}]  }
   0x1   :  { %v14_v0 = vld [vmem:[%s56_s0] sm:$0x1] }
   0x2   :  { %v15_v1 = vld [vmem:[%s57_s1] sm:$0x1] }
   0x3   :  { %v17_v2 = vld [vmem:[%s58_s2] sm:$0x1]  ;;  %v16_v3 = vmax.f32 %v14_v0, %v15_v1 }
   0x5   :  { %v18_v4 = vmin.f32 %v16_v3, %v17_v2 }
   0x7   :  { %19 = vst [vmem:[%s59_s3] sm:$0x1] %v18_v4 }

</bundles_post_ra>
